<compile_context>
chip_gen: v5e
topology: v5e:2x2
jax: 0.10.0
libtpu: 0.0.40
codegen_flags: <defaults>
</compile_context>

<pallas_src>
import jax
import jax.numpy as jnp
from jax.experimental import pallas as pl
from jax.experimental.pallas import tpu as pltpu

_LANE = 128      # vreg lane width (last dim)
_SUBLANE = 8     # vreg sublane count (second-to-last dim)


def _round_up(n, m):
    return ((n + m - 1) // m) * m


def ffnn_kernel(x_ref, w1_ref, b1_ref, w2_ref, b2_ref, o_ref):
    # fc1: [Bp, Fp] @ [Fp, Hp] + [1, Hp]   (f32 accumulation on the MXU)
    h = jnp.dot(x_ref[...], w1_ref[...],
                preferred_element_type=jnp.float32) + b1_ref[...]
    # fc2: [Bp, Hp] @ [Hp, Cp] + [1, Cp]
    y = jnp.dot(h, w2_ref[...],
                preferred_element_type=jnp.float32) + b2_ref[...]
    o_ref[...] = y.astype(o_ref.dtype)


def prepare_params(w1, b1, w2, b2):
    """One-time parameter prep (outside the hot path).

    Torch layout: w1 [hidden, F], b1 [hidden], w2 [n_classes, hidden],
    b2 [n_classes].  Returns transposed, zero-padded, lane-dense tensors:
      w1_t [Fp, Hp], b1_r [1, Hp], w2_t [Hp, Cp], b2_r [1, Cp].
    Padded rows/columns are zero so un-padded outputs are exact.
    """
    Hd, F = w1.shape
    C = w2.shape[0]
    Fp = _round_up(F, _LANE)
    Hp = _round_up(Hd, _LANE)
    Cp = _round_up(C, _LANE)

    w1_t = jnp.zeros((Fp, Hp), jnp.float32).at[:F, :Hd].set(w1.T)
    b1_r = jnp.zeros((1, Hp), jnp.float32).at[0, :Hd].set(b1)
    w2_t = jnp.zeros((Hp, Cp), jnp.float32).at[:Hd, :C].set(w2.T)
    b2_r = jnp.zeros((1, Cp), jnp.float32).at[0, :C].set(b2)

    return {
        "w1_t": w1_t, "b1_r": b1_r, "w2_t": w2_t, "b2_r": b2_r,
        "F": F, "C": C, "Fp": Fp, "Hp": Hp, "Cp": Cp,
    }


def ffnn_forward(x_nchw, params):
    """x_nchw: [B, C, H, W] float32; params from prepare_params."""
    B = x_nchw.shape[0]
    x_flat = x_nchw.reshape(B, -1)            # nn.Flatten (row-major)
    F, Fp = params["F"], params["Fp"]
    C, Cp = params["C"], params["Cp"]
    Bp = _round_up(B, _SUBLANE)

    # Zero-pad activations to (sublane, lane)-dense shape.
    x_pad = jnp.zeros((Bp, Fp), jnp.float32).at[:B, :F].set(x_flat)

    vmem = pltpu.MemorySpace.VMEM
    out_pad = pl.pallas_call(
        ffnn_kernel,
        out_shape=jax.ShapeDtypeStruct((Bp, Cp), jnp.float32),
        # No grid: everything lives in VMEM as a single full block, no
        # software pipeline, no double buffering.
        in_specs=[
            pl.BlockSpec(memory_space=vmem),   # x_pad   [Bp, Fp]
            pl.BlockSpec(memory_space=vmem),   # w1_t    [Fp, Hp]
            pl.BlockSpec(memory_space=vmem),   # b1_r    [1, Hp]
            pl.BlockSpec(memory_space=vmem),   # w2_t    [Hp, Cp]
            pl.BlockSpec(memory_space=vmem),   # b2_r    [1, Cp]
        ],
        out_specs=pl.BlockSpec(memory_space=vmem),
    )(x_pad, params["w1_t"], params["b1_r"], params["w2_t"], params["b2_r"])

    # Drop padding (padded rows/cols are exact zeros of no consequence).
    return out_pad[:B, :C]


def init_linear(key, out_features, in_features):
    """Deterministic init mimicking torch.nn.Linear (uniform +/- 1/sqrt(fan_in))."""
    kw, kb = jax.random.split(key)
    bound = 1.0 / (in_features ** 0.5)
    w = jax.random.uniform(kw, (out_features, in_features),
                           minval=-bound, maxval=bound, dtype=jnp.float32)
    b = jax.random.uniform(kb, (out_features,),
                           minval=-bound, maxval=bound, dtype=jnp.float32)
    return w, b


if __name__ == "__main__":
    # Small shapes consistent with the module: flatten(NCHW) -> fc1 -> fc2.
    B, Cin, Hh, Ww = 2, 1, 8, 8            # input_size = 64
    input_size = Cin * Hh * Ww
    hidden_size = 32
    n_classes = 10

    root = jax.random.PRNGKey(0)
    kx, k1, k2 = jax.random.split(root, 3)

    x = jax.random.normal(kx, (B, Cin, Hh, Ww), dtype=jnp.float32)
    w1, b1 = init_linear(k1, hidden_size, input_size)
    w2, b2 = init_linear(k2, n_classes, hidden_size)

    params = prepare_params(w1, b1, w2, b2)   # one-time layout/padding prep
    out = ffnn_forward(x, params)
    out = jax.block_until_ready(out)

    # Pure-JAX reference check (un-padded math, torch layout).
    x_flat = x.reshape(B, -1)
    ref = (x_flat @ w1.T + b1) @ w2.T + b2
    assert out.shape == (B, n_classes)
    assert jnp.allclose(out, ref, atol=1e-5, rtol=1e-5)

    print("KERNEL_OK")
</pallas_src>

<mosaic_0001>
module attributes {stable_mosaic.version = 11 : i64} {
  func.func @ffnn_kernel(%arg0: memref<8x128xf32, #tpu.memory_space<vmem>>, %arg1: memref<128x128xf32, #tpu.memory_space<vmem>>, %arg2: memref<1x128xf32, #tpu.memory_space<vmem>>, %arg3: memref<128x128xf32, #tpu.memory_space<vmem>>, %arg4: memref<1x128xf32, #tpu.memory_space<vmem>>, %arg5: memref<8x128xf32, #tpu.memory_space<vmem>>) attributes {dimension_semantics = [], scalar_prefetch = 0 : i64, scratch_operands = 0 : i64, tpu.core_type = #tpu.core_type<tc>} {
    %c0 = arith.constant 0 : index
    %c0_0 = arith.constant 0 : index
    %0 = vector.load %arg0[%c0, %c0_0] : memref<8x128xf32, #tpu.memory_space<vmem>>, vector<8x128xf32>
    %c0_1 = arith.constant 0 : index
    %c0_2 = arith.constant 0 : index
    %1 = vector.load %arg1[%c0_1, %c0_2] : memref<128x128xf32, #tpu.memory_space<vmem>>, vector<128x128xf32>
    %cst = arith.constant dense<0.000000e+00> : vector<8x128xf32>
    %2 = tpu.matmul %0, %1, %cst {dimension_numbers = #tpu.dot_dimension_numbers<[1], [0], [0], [1], [0, 0, 1, 1], [], []>} : vector<8x128xf32>, vector<128x128xf32>, vector<8x128xf32> -> vector<8x128xf32>
    %c0_3 = arith.constant 0 : index
    %c0_4 = arith.constant 0 : index
    %3 = vector.load %arg2[%c0_3, %c0_4] : memref<1x128xf32, #tpu.memory_space<vmem>>, vector<1x128xf32>
    %4 = vector.broadcast %3 : vector<1x128xf32> to vector<8x128xf32>
    %5 = arith.addf %2, %4 : vector<8x128xf32>
    %c0_5 = arith.constant 0 : index
    %c0_6 = arith.constant 0 : index
    %6 = vector.load %arg3[%c0_5, %c0_6] : memref<128x128xf32, #tpu.memory_space<vmem>>, vector<128x128xf32>
    %cst_7 = arith.constant dense<0.000000e+00> : vector<8x128xf32>
    %7 = tpu.matmul %5, %6, %cst_7 {dimension_numbers = #tpu.dot_dimension_numbers<[1], [0], [0], [1], [0, 0, 1, 1], [], []>} : vector<8x128xf32>, vector<128x128xf32>, vector<8x128xf32> -> vector<8x128xf32>
    %c0_8 = arith.constant 0 : index
    %c0_9 = arith.constant 0 : index
    %8 = vector.load %arg4[%c0_8, %c0_9] : memref<1x128xf32, #tpu.memory_space<vmem>>, vector<1x128xf32>
    %9 = vector.broadcast %8 : vector<1x128xf32> to vector<8x128xf32>
    %10 = arith.addf %7, %9 : vector<8x128xf32>
    %c0_10 = arith.constant 0 : index
    %c0_11 = arith.constant 0 : index
    %11 = vector.load %arg5[%c0_10, %c0_11] : memref<8x128xf32, #tpu.memory_space<vmem>>, vector<8x128xf32>
    tpu.vector_store %arg5[%c0_10, %c0_11], %10 {strides = array<i32>} : memref<8x128xf32, #tpu.memory_space<vmem>>, vector<8x128xf32>,
    return
  }
}

</mosaic_0001>

<bundles_post_ra>
// kernel: tpu_custom_call.1
= control target key start
LH: loop header
LB: loop body
LE: loop exit
PB: predicated region body
PF: predicated region fallthrough
CT: control target
= control target key end

     0   :  { %10 = vsyncpa [#allocation3], 0  ;;  %s330_s0 = inlined_call_operand.hbm [shape: f32[8,128], index: 0, kind: input, shape index: {}]   ;;  %s331_s1 = inlined_call_operand.hbm [shape: f32[128,128], index: 1, kind: input, shape index: {}]   ;;  %s332_s2 = inlined_call_operand.vmem [shape: f32[1,128], index: 2, kind: input, shape index: {}]   ;;  %s333_s3 = inlined_call_operand.hbm [shape: f32[128,128], index: 3, kind: input, shape index: {}]   ;;  %s334_s4 = inlined_call_operand.vmem [shape: f32[1,128], index: 4, kind: input, shape index: {}]   ;;  %s335_s5 = inlined_call_operand.hbm [shape: f32[8,128], index: 5, kind: output, shape index: {}]  }
   0x1   :  { %11 = vsyncpa [#allocation6], 0  ;;  %s28_s20 = sshll.u32 %s331_s1, 4  ;;  %s29_s20 = int_to_ptr.hbm [resolvable:$true] %s28_s20 }
   0x2   :  { %12 = vsyncpa [#allocation4], 0  ;;  %s276_s21 = smov [#allocation5]   ;;  %s18_s25 = sshll.u32 %s330_s0, 4  ;;  %s19_s25 = int_to_ptr.hbm [resolvable:$true] %s18_s25 }
   0x3   :  { %s30_s22 = sshll.u32 %s276_s21, 4  ;;  %s277_s26 = smov 128   ;;  %s31_s22 = int_to_ptr.vmem [resolvable:$true] %s30_s22 }
   0x4   :  { %s278_s27 = smov 8   ;;  %s279_s28 = smov [#allocation2]  }
   0x5   :  { %36 = dma.hbm_to_vmem [thread:$0]  %s29_s20, 2048, %s31_s22, [#allocation6], %s277_s26, %s277_s26, %s278_s27  }
   0x6   :  { %s20_s29 = sshll.u32 %s279_s28, 4  ;;  %s43_s7 = sshll.u32 %s333_s3, 4  ;;  %s21_s29 = int_to_ptr.vmem [resolvable:$true] %s20_s29  ;;  %s44_s7 = int_to_ptr.hbm [resolvable:$true] %s43_s7 }
   0x7   :  { %23 = dma.hbm_to_vmem [thread:$0]  %s19_s25, 128, %s21_s29, [#allocation3]  }
   0x8   :  { %s280_s1 = smov [#allocation7]  }
   0x9   :  { %s45_s8 = sshll.u32 %s280_s1, 4  ;;  %s46_s8 = int_to_ptr.vmem [resolvable:$true] %s45_s8 }
   0xa   :  { %51 = dma.hbm_to_vmem [thread:$0]  %s44_s7, 2048, %s46_s8, [#allocation6], %s277_s26, %s277_s26, %s278_s27  }
   0xb   :  { %270 = dma.done.wait [#allocation3], 128  }
   0xc   :  { %271 = vsyncadd [#allocation3], 4294967168 }
   0xd   :  { %272 = dma.done.wait [#allocation6], 4096  }
   0xe   :  { %273 = vsyncadd [#allocation6], 4294963200  ;;  %v82_v0 = vld [vmem:[#allocation5 + $0x78] sm:$0xff]  ;;  %v81_v1 = vld [vmem:[#allocation5 + $0x70] sm:$0xff]  ;;  %s281_s11 = smov [#allocation8]   ;;  %s155_s15 = sshll.u32 %s335_s5, 4  ;;  %s156_s15 = int_to_ptr.hbm [resolvable:$true] %s155_s15 }
   0xf   :  { %87 = vmatpush.msra.mxu0 %v82_v0  ;;  %v80_v2 = vld [vmem:[#allocation5 + $0x68] sm:$0xff]  ;;  %v79_v3 = vld [vmem:[#allocation5 + $0x60] sm:$0xff]  ;;  %v122_v4 = vld [vmem:[#allocation7 + $0x78] sm:$0xff]  ;;  %s153_s12 = sshll.u32 %s281_s11, 4  ;;  %s154_s12 = int_to_ptr.vmem [resolvable:$true] %s153_s12 }
  0x10   :  { %v78_v5 = vld [vmem:[#allocation5 + $0x58] sm:$0xff]  ;;  %127 = vmatpush.msra.mxu1 %v122_v4  ;;  %v121_v6 = vld [vmem:[#allocation7 + $0x70] sm:$0xff]  ;;  %v120_v7 = vld [vmem:[#allocation7 + $0x68] sm:$0xff] }
  0x11   :  { %88 = vmatpush.msra.mxu0 %v81_v1  ;;  %v77_v8 = vld [vmem:[#allocation5 + $0x50] sm:$0xff]  ;;  %v119_v9 = vld [vmem:[#allocation7 + $0x60] sm:$0xff]  ;;  %v76_v10 = vld [vmem:[#allocation5 + $0x48] sm:$0xff] }
  0x12   :  { %128 = vmatpush.msra.mxu1 %v121_v6  ;;  %v118_v11 = vld [vmem:[#allocation7 + $0x58] sm:$0xff]  ;;  %v75_v12 = vld [vmem:[#allocation5 + $0x40] sm:$0xff]  ;;  %v117_v13 = vld [vmem:[#allocation7 + $0x50] sm:$0xff] }
  0x13   :  { %89 = vmatpush.msra.mxu0 %v80_v2  ;;  %v74_v14 = vld [vmem:[#allocation5 + $0x38] sm:$0xff]  ;;  %v116_v15 = vld [vmem:[#allocation7 + $0x48] sm:$0xff]  ;;  %v73_v16 = vld [vmem:[#allocation5 + $0x30] sm:$0xff] }
  0x14   :  { %129 = vmatpush.msra.mxu1 %v120_v7  ;;  %v115_v17 = vld [vmem:[#allocation7 + $0x40] sm:$0xff]  ;;  %v72_v18 = vld [vmem:[#allocation5 + $0x28] sm:$0xff]  ;;  %v114_v19 = vld [vmem:[#allocation7 + $0x38] sm:$0xff] }
  0x15   :  { %90 = vmatpush.msra.mxu0 %v79_v3  ;;  %v71_v20 = vld [vmem:[#allocation5 + $0x20] sm:$0xff]  ;;  %v113_v21 = vld [vmem:[#allocation7 + $0x30] sm:$0xff]  ;;  %v70_v22 = vld [vmem:[#allocation5 + $0x18] sm:$0xff] }
  0x16   :  { %130 = vmatpush.msra.mxu1 %v119_v9  ;;  %v112_v23 = vld [vmem:[#allocation7 + $0x28] sm:$0xff]  ;;  %v69_v24 = vld [vmem:[#allocation5 + $0x10] sm:$0xff]  ;;  %v111_v25 = vld [vmem:[#allocation7 + $0x20] sm:$0xff] }
  0x17   :  { %91 = vmatpush.msra.mxu0 %v78_v5  ;;  %v68_v26 = vld [vmem:[#allocation5 + $0x8] sm:$0xff]  ;;  %v110_v27 = vld [vmem:[#allocation7 + $0x18] sm:$0xff]  ;;  %v67_v28 = vld [vmem:[#allocation5] sm:$0xff] }
  0x18   :  { %131 = vmatpush.msra.mxu1 %v118_v11  ;;  %v66_v29 = vld [vmem:[#allocation2] sm:$0xff]  ;;  %v109_v30 = vld [vmem:[#allocation7 + $0x10] sm:$0xff]  ;;  %v108_v31 = vld [vmem:[#allocation7 + $0x8] sm:$0xff] }
  0x19   :  { %92 = vmatpush.msra.mxu0 %v77_v8  ;;  %v107_v32 = vld [vmem:[#allocation7] sm:$0xff]  ;;  %v172_v33 = vld [vmem:[%s332_s2] ss:$0 sm:$0xff] }
  0x1a   :  { %132 = vmatpush.msra.mxu1 %v117_v13  ;;  %v173_v36 = vld [vmem:[%s334_s4] ss:$0 sm:$0xff] }
  0x1b   :  { %93 = vmatpush.msra.mxu0 %v76_v10 }
  0x1c   :  { %133 = vmatpush.msra.mxu1 %v116_v15 }
  0x1d   :  { %94 = vmatpush.msra.mxu0 %v75_v12 }
  0x1e   :  { %134 = vmatpush.msra.mxu1 %v115_v17 }
  0x1f   :  { %95 = vmatpush.msra.mxu0 %v74_v14 }
  0x20   :  { %135 = vmatpush.msra.mxu1 %v114_v19 }
  0x21   :  { %96 = vmatpush.msra.mxu0 %v73_v16 }
  0x22   :  { %136 = vmatpush.msra.mxu1 %v113_v21 }
  0x23   :  { %97 = vmatpush.msra.mxu0 %v72_v18 }
  0x24   :  { %137 = vmatpush.msra.mxu1 %v112_v23 }
  0x25   :  { %98 = vmatpush.msra.mxu0 %v71_v20 }
  0x26   :  { %138 = vmatpush.msra.mxu1 %v111_v25 }
  0x27   :  { %99 = vmatpush.msra.mxu0 %v70_v22 }
  0x28   :  { %139 = vmatpush.msra.mxu1 %v110_v27 }
  0x29   :  { %100 = vmatpush.msra.mxu0 %v69_v24 }
  0x2a   :  { %140 = vmatpush.msra.mxu1 %v109_v30 }
  0x2b   :  { %101 = vmatpush.msra.mxu0 %v68_v26 }
  0x2c   :  { %141 = vmatpush.msra.mxu1 %v108_v31 }
  0x2d   :  { %102 = vmatpush.msra.mxu0 %v67_v28 }
  0x2e   :  { %103 = vmatmul.f32.vlgmr.msra.gmra.mxu0 %v66_v29  ;;  %142 = vmatpush.msra.mxu1 %v107_v32 }
  0xab   :  { %v104_v34 = vpop.f32.mrf.mxu0 }
  0xac   :  { %v105_v35 = vadd.f32 %v172_v33, %v104_v34 }
  0xae   :  { %143 = vmatmul.f32.vlgmr.msra.gmra.mxu1 %v105_v35 }
 0x12b   :  { %v144_v37 = vpop.f32.mrf.mxu1 }
 0x12c   :  { %v145_v38 = vadd.f32 %v173_v36, %v144_v37 }
 0x12e   :  { %147 = vst [vmem:[#allocation8] sm:$0xff] %v145_v38 }
 0x12f   :  { %158 = dma.vmem_to_hbm [thread:$0]  %s154_s12, 128, %s156_s15, [#allocation4]  }
 0x130   :  { %274 = dma.done.wait [#allocation4], 128  }
 0x131   :  { %275 = vsyncadd [#allocation4], 4294967168 }
 0x132   :  { %163 = vsyncpa [#allocation3], 1 }
 0x133   :  { %164 = vsyncpa [#allocation6], 1 }
 0x134   :  { %165 = vsyncpa [#allocation4], 1 }

</bundles_post_ra>
